<compile_context>
chip_gen: v5e
topology: v5e:2x2
jax: 0.10.0
libtpu: 0.0.40
codegen_flags: <defaults>
</compile_context>

<pallas_src>
import functools

import jax
import jax.numpy as jnp
from jax.experimental import pallas as pl
from jax.experimental.pallas import tpu as pltpu

IGNORE_INDEX = -100


def _round_up(x, m):
    return (x + m - 1) // m * m


def kl_ce_kernel(logits_ref, tgt_ref, part_ref, *, batch_size):
    # logits_ref: (1, TB, C)  native float dtype (VMEM)
    # tgt_ref   : (1, 1, TB)  int32
    # part_ref  : (1, 1, TB)  f32 per-sample, per-row running partial sums
    #             (resident across the B-tile grid axis).
    j = pl.program_id(1)

    @pl.when(j == 0)
    def _init():
        part_ref[...] = jnp.zeros_like(part_ref)

    x = logits_ref[...]                                   # (1, TB, C) input dtype
    tgt = tgt_ref[0]                                      # (1, TB) i32
    _, tb, c = x.shape

    # one-hot column match: (1,1,C) iota broadcast against (1,TB,1) targets
    # (ignore_index = -100 never matches any class column).
    col = jax.lax.broadcasted_iota(jnp.int32, (1, 1, c), 2)
    onehot = col == tgt[:, :, None]                       # (1, TB, C)

    # max-shift in the input dtype (packed bf16 VPU on v6e/v7x); max is exact.
    m = jnp.max(x, axis=-1, keepdims=True)                # (1, TB, 1)
    shifted = (x - m).astype(jnp.float32)                 # cast at the EUP edge
    sumexp = jnp.sum(jnp.exp(shifted), axis=-1)           # (1, TB) f32
    zero = jnp.zeros((), x.dtype)
    picked = jnp.sum(jnp.where(onehot, x, zero), axis=-1) # (1, TB) input dtype
    # picked and m are exactly representable in f32 -> exact subtraction.
    per_elem = jnp.log(sumexp) - (picked.astype(jnp.float32)
                                  - m[..., 0].astype(jnp.float32))   # (1, TB)

    # Mask ignore_index targets and rows past B (partial last tile / OOB rows).
    # Select (not multiply) so NaN/inf in untaken rows never propagates.
    row = j * tb + jax.lax.broadcasted_iota(jnp.int32, (1, tb), 1)
    valid = jnp.logical_and(tgt != IGNORE_INDEX, row < batch_size)
    per_elem = jnp.where(valid, per_elem, 0.0)            # (1, TB) f32

    part_ref[...] += per_elem[:, None, :]                 # pure VPU accumulate


@functools.partial(jax.jit, static_argnames=("block_bytes",))
def kl_loss(outputs, target, kl, batch_weight, *, block_bytes=8 * 1024 * 1024):
    """outputs: (S, B, C) float (f32/bf16); target: (B,) int; kl, batch_weight scalars."""
    S, B, C = outputs.shape
    dtype = outputs.dtype
    dtype_bytes = jnp.dtype(dtype).itemsize

    # --- tile geometry: per-block logits ~<= block_bytes, TB on the sublane grid.
    lanes = _round_up(C, 128)                      # VMEM lane padding of one row
    bytes_per_row = lanes * dtype_bytes
    tb_cap = max(8, (block_bytes // max(1, bytes_per_row)) // 8 * 8)
    TB = tb_cap if tb_cap < B else B               # full-B tile is always legal
    NB = (B + TB - 1) // TB
    # TODO(synk): for extreme vocabularies where a single 8-row slab exceeds VMEM,
    #             a third grid axis over C with an online-logsumexp accumulator is
    #             required; not implemented here.

    # --- only the tiny (B,) target is padded (to NB*TB, with ignore_index).
    tgt = target.astype(jnp.int32)
    if NB * TB != B:
        tgt = jnp.pad(tgt, (0, NB * TB - B), constant_values=IGNORE_INDEX)
    tgt3d = tgt.reshape(NB, 1, TB)

    logits_block_bytes = TB * lanes * dtype_bytes
    # 2x double-buffered logits + slack for target/output/compiler scratch;
    # stays well inside v7x's 64 MiB VMEM at the default 8 MiB block.
    vmem_limit = int(max(16 * 1024 * 1024, 2 * logits_block_bytes + 6 * 1024 * 1024))

    cost = pl.CostEstimate(
        flops=6 * S * B * C,
        transcendentals=S * B * C + S * B,          # exp + log
        bytes_accessed=S * B * C * dtype_bytes + B * 4 + S * TB * 4,
    )

    partials = pl.pallas_call(
        functools.partial(kl_ce_kernel, batch_size=B),
        out_shape=jax.ShapeDtypeStruct((S, 1, TB), jnp.float32),
        grid=(S, NB),
        in_specs=[
            pl.BlockSpec((1, TB, C), lambda i, j: (i, j, 0)),   # logits tile
            pl.BlockSpec((1, 1, TB), lambda i, j: (j, 0, 0)),   # target tile
        ],
        out_specs=pl.BlockSpec((1, 1, TB), lambda i, j: (i, 0, 0)),
        compiler_params=pltpu.CompilerParams(
            dimension_semantics=("parallel", "arbitrary"),
            vmem_limit_bytes=vmem_limit,
        ),
        cost_estimate=cost,
    )(outputs, tgt3d)

    # TODO(synk): when S == 1 on v7x, a leading parallel split of the B-tile axis
    #             would feed both TensorCores; omitted to keep the grid simple.
    ce_mean = jnp.sum(partials) / jnp.float32(S)
    return jnp.asarray(batch_weight, jnp.float32) * jnp.asarray(kl, jnp.float32) + ce_mean


def kl_loss_ref(outputs, target, kl, batch_weight):
    """Pure-JAX reference of the PyTorch forward (for sanity checking)."""
    outputs = outputs.astype(jnp.float32)
    valid = target != IGNORE_INDEX
    safe_tgt = jnp.where(valid, target, 0)
    lse = jax.nn.logsumexp(outputs, axis=-1)                               # (S, B)
    picked = jnp.take_along_axis(outputs, safe_tgt[None, :, None], axis=-1)[..., 0]
    per_elem = (lse - picked) * valid[None, :].astype(jnp.float32)
    ce = jnp.mean(jnp.sum(per_elem, axis=-1))
    return jnp.float32(batch_weight) * jnp.float32(kl) + ce


if __name__ == "__main__":
    key = jax.random.PRNGKey(0)
    k1, k2, k3, k4 = jax.random.split(key, 4)

    kl = jnp.float32(1.7)
    batch_weight = jnp.float32(0.25)

    # --- small config: single B tile, C not a multiple of 128 ---
    S, B, C = 4, 8, 32
    outputs = jax.random.normal(k1, (S, B, C), dtype=jnp.float32)
    target = jax.random.randint(k2, (B,), 0, C, dtype=jnp.int32)
    target = target.at[3].set(IGNORE_INDEX)        # exercise ignore_index path

    got = jax.block_until_ready(kl_loss(outputs, target, kl, batch_weight))
    want = jax.block_until_ready(kl_loss_ref(outputs, target, kl, batch_weight))
    assert jnp.allclose(got, want, rtol=1e-5, atol=1e-5), (got, want)

    # native bf16 path (mixed-precision inner loop; no host-side upcast)
    out_bf16 = outputs.astype(jnp.bfloat16)
    got_bf = jax.block_until_ready(kl_loss(out_bf16, target, kl, batch_weight))
    want_bf = jax.block_until_ready(kl_loss_ref(out_bf16, target, kl, batch_weight))
    assert jnp.allclose(got_bf, want_bf, rtol=2e-2, atol=2e-2), (got_bf, want_bf)

    # --- multi-tile config: exercises accumulation across B tiles + the masked
    #     partial last tile (B not a multiple of TB), via a small block budget.
    S2, B2, C2 = 2, 300, 160
    outputs2 = jax.random.normal(k3, (S2, B2, C2), dtype=jnp.float32)
    target2 = jax.random.randint(k4, (B2,), 0, C2, dtype=jnp.int32)
    target2 = target2.at[0].set(IGNORE_INDEX)
    target2 = target2.at[257].set(IGNORE_INDEX)
    got2 = jax.block_until_ready(
        kl_loss(outputs2, target2, kl, batch_weight, block_bytes=64 * 1024))
    want2 = jax.block_until_ready(kl_loss_ref(outputs2, target2, kl, batch_weight))
    assert jnp.allclose(got2, want2, rtol=1e-5, atol=1e-3), (got2, want2)

    print("KERNEL_OK")
</pallas_src>

<mosaic_0001>
module attributes {stable_mosaic.version = 11 : i64} {
  func.func @kl_ce_kernel(%arg0: i32, %arg1: i32, %arg2: memref<1x8x32xf32, #tpu.memory_space<vmem>>, %arg3: memref<1x1x8xi32, #tpu.memory_space<vmem>>, %arg4: memref<1x1x8xf32, #tpu.memory_space<vmem>>) attributes {dimension_semantics = [#tpu.dimension_semantics<parallel>, #tpu.dimension_semantics<arbitrary>], iteration_bounds = array<i64: 4, 1>, scalar_prefetch = 0 : i64, scratch_operands = 0 : i64, tpu.core_type = #tpu.core_type<tc>, window_params = [{transform_indices = @transform_0, window_bounds = array<i64: 1, 8, 32>}, {transform_indices = @transform_1, window_bounds = array<i64: 1, 1, 8>}, {transform_indices = @transform_2, window_bounds = array<i64: 1, 1, 8>}]} {
    %c0_i32 = arith.constant 0 : i32
    %0 = arith.cmpi eq, %arg1, %c0_i32 : i32
    %1 = arith.extui %0 : i1 to i32
    %c0_i32_0 = arith.constant 0 : i32
    %2 = arith.cmpi ne, %1, %c0_i32_0 : i32
    scf.if %2 {
      %cst_17 = arith.constant 0.000000e+00 : f32
      %39 = vector.broadcast %cst_17 : f32 to vector<1x1x8xf32>
      %c0_18 = arith.constant 0 : index
      %c0_19 = arith.constant 0 : index
      %c0_20 = arith.constant 0 : index
      %40 = vector.load %arg4[%c0_18, %c0_19, %c0_20] : memref<1x1x8xf32, #tpu.memory_space<vmem>>, vector<1x1x8xf32>
      tpu.vector_store %arg4[%c0_18, %c0_19, %c0_20], %39 {strides = array<i32>} : memref<1x1x8xf32, #tpu.memory_space<vmem>>, vector<1x1x8xf32>,
    } else {
    }
    %c0 = arith.constant 0 : index
    %c0_1 = arith.constant 0 : index
    %c0_2 = arith.constant 0 : index
    %3 = vector.load %arg2[%c0, %c0_1, %c0_2] : memref<1x8x32xf32, #tpu.memory_space<vmem>>, vector<1x8x32xf32>
    %c0_3 = arith.constant 0 : index
    %c0_4 = arith.constant 0 : index
    %c0_5 = arith.constant 0 : index
    %4 = vector.load %arg3[%c0_3, %c0_4, %c0_5] : memref<1x1x8xi32, #tpu.memory_space<vmem>>, vector<1x1x8xi32>
    %5 = vector.shape_cast %4 : vector<1x1x8xi32> to vector<1x8xi32>
    %6 = tpu.iota {dimensions = array<i32: 2>} : vector<1x1x32xi32>
    %7 = vector.shape_cast %5 : vector<1x8xi32> to vector<1x8x1xi32>
    %8 = vector.broadcast %6 : vector<1x1x32xi32> to vector<1x8x32xi32>
    %9 = vector.broadcast %7 : vector<1x8x1xi32> to vector<1x8x32xi32>
    %10 = arith.cmpi eq, %8, %9 : vector<1x8x32xi32>
    %cst = arith.constant dense<0xFF800000> : vector<1x8xf32>
    %11 = vector.multi_reduction <maximumf>, %3, %cst [2] : vector<1x8x32xf32> to vector<1x8xf32>
    %12 = vector.shape_cast %11 : vector<1x8xf32> to vector<1x8x1xf32>
    %13 = vector.broadcast %12 : vector<1x8x1xf32> to vector<1x8x32xf32>
    %14 = arith.subf %3, %13 : vector<1x8x32xf32>
    %15 = math.exp %14 : vector<1x8x32xf32>
    %cst_6 = arith.constant dense<0.000000e+00> : vector<1x8xf32>
    %16 = vector.multi_reduction <add>, %15, %cst_6 [2] : vector<1x8x32xf32> to vector<1x8xf32>
    %cst_7 = arith.constant 0.000000e+00 : f32
    %17 = vector.broadcast %cst_7 : f32 to vector<1x8x32xf32>
    %18 = arith.select %10, %3, %17 : vector<1x8x32xi1>, vector<1x8x32xf32>
    %cst_8 = arith.constant dense<0.000000e+00> : vector<1x8xf32>
    %19 = vector.multi_reduction <add>, %18, %cst_8 [2] : vector<1x8x32xf32> to vector<1x8xf32>
    %20 = math.log %16 : vector<1x8xf32>
    %21 = vector.shape_cast %12 : vector<1x8x1xf32> to vector<1x8xf32>
    %22 = arith.subf %19, %21 : vector<1x8xf32>
    %23 = arith.subf %20, %22 : vector<1x8xf32>
    %c8_i32 = arith.constant 8 : i32
    %24 = arith.muli %arg1, %c8_i32 : i32
    %25 = tpu.iota {dimensions = array<i32: 1>} : vector<1x8xi32>
    %26 = vector.broadcast %24 : i32 to vector<1x8xi32>
    %27 = arith.addi %26, %25 : vector<1x8xi32>
    %c-100_i32 = arith.constant -100 : i32
    %28 = vector.broadcast %c-100_i32 : i32 to vector<1x8xi32>
    %29 = arith.cmpi ne, %5, %28 : vector<1x8xi32>
    %c8_i32_9 = arith.constant 8 : i32
    %30 = vector.broadcast %c8_i32_9 : i32 to vector<1x8xi32>
    %31 = arith.cmpi slt, %27, %30 : vector<1x8xi32>
    %32 = arith.andi %29, %31 : vector<1x8xi1>
    %cst_10 = arith.constant 0.000000e+00 : f32
    %33 = vector.broadcast %cst_10 : f32 to vector<1x8xf32>
    %34 = arith.select %32, %23, %33 : vector<1x8xi1>, vector<1x8xf32>
    %c0_11 = arith.constant 0 : index
    %c0_12 = arith.constant 0 : index
    %c0_13 = arith.constant 0 : index
    %35 = vector.load %arg4[%c0_11, %c0_12, %c0_13] : memref<1x1x8xf32, #tpu.memory_space<vmem>>, vector<1x1x8xf32>
    %36 = vector.shape_cast %34 : vector<1x8xf32> to vector<1x1x8xf32>
    %37 = arith.addf %35, %36 : vector<1x1x8xf32>
    %c0_14 = arith.constant 0 : index
    %c0_15 = arith.constant 0 : index
    %c0_16 = arith.constant 0 : index
    %38 = vector.load %arg4[%c0_14, %c0_15, %c0_16] : memref<1x1x8xf32, #tpu.memory_space<vmem>>, vector<1x1x8xf32>
    tpu.vector_store %arg4[%c0_14, %c0_15, %c0_16], %37 {strides = array<i32>} : memref<1x1x8xf32, #tpu.memory_space<vmem>>, vector<1x1x8xf32>,
    return
  }
  func.func @transform_0(%arg0: i32, %arg1: i32) -> (i32, i32, i32) {
    %c0_i32 = arith.constant 0 : i32
    %c0_i32_0 = arith.constant 0 : i32
    return %arg0, %arg1, %c0_i32 : i32, i32, i32
  }
  func.func @transform_1(%arg0: i32, %arg1: i32) -> (i32, i32, i32) {
    %c0_i32 = arith.constant 0 : i32
    %c0_i32_0 = arith.constant 0 : i32
    %c0_i32_1 = arith.constant 0 : i32
    return %arg1, %c0_i32, %c0_i32_0 : i32, i32, i32
  }
  func.func @transform_2(%arg0: i32, %arg1: i32) -> (i32, i32, i32) {
    %c0_i32 = arith.constant 0 : i32
    %c0_i32_0 = arith.constant 0 : i32
    %c0_i32_1 = arith.constant 0 : i32
    return %arg0, %c0_i32, %c0_i32_0 : i32, i32, i32
  }
}

</mosaic_0001>

<bundles_post_ra>
// kernel: kl_loss.1
= control target key start
LH: loop header
LB: loop body
LE: loop exit
PB: predicated region body
PF: predicated region fallthrough
CT: control target
= control target key end

     0   :  { %7 = vsyncpa [#allocation3], 0  ;;  %s624_s0 = inlined_call_operand.hbm [shape: f32[4,8,32], index: 0, kind: input, shape index: {}]   ;;  %s625_s1 = inlined_call_operand.vmem [shape: s32[1,1,8], index: 1, kind: input, shape index: {}]   ;;  %s626_s2 = inlined_call_operand.vmem [shape: f32[4,1,8], index: 2, kind: output, shape index: {}]  }
   0x1   :  { %9 = vsyncpa [#allocation3 + $0x1], 0  ;;  %s520_s9 = smov 0   ;;  %s522_s10 = smov 0  }
   0x2   :  { %s524_s11 = smov 0   ;;  %s526_s12 = smov 0  }
   0x3   :  { %s528_s13 = smov 0   ;;  %s530_s14 = smov 0  }
   0x4 LB: > { %s345_s15 = sadd.s32 4294967295, %s501_s14   ;;  %s27_s16 = sadd.s32 1, %s497_s13  ;;  %s501_s14 = sphi %s530_s14, %s15_s14   ;;  %s497_s13 = sphi %s528_s13, %s633_s13   ;;  %s493_s12 = sphi %s526_s12, %s632_s12   ;;  %s489_s11 = sphi %s524_s11, %s631_s11   ;;  %s485_s10 = sphi %s522_s10, %s630_s10   ;;  %s481_s9 = sphi %s520_s9, %s629_s9  }
   0x5   : > { %p29_p0 = scmp.ge.s32.totalorder %s27_s16, 4  ;;  %s36_s17 = sadd.s32 1, %s489_s11 }
   0x6   : > { %p43_p1 = scmp.ne.s32.totalorder %s489_s11, %s485_s10  ;;  %p44_p2 = scmp.eq.s32.totalorder %s501_s14, 0 }
   0x7   : > { %s635_s16 = smov (%p29_p0, %s27_s16), 0  ;;  %p49_p4 = scmp.ne.s32.totalorder %s485_s10, %s481_s9 }
   0x8   : > { %p556_p3 = por %p44_p2, %p43_p1  ;;  %s31_s19 = ssub.s32 %s497_s13, %s635_s16 }
   0x9   : > { %p50_p5 = scmp.eq.s32.totalorder %s345_s15, 0  ;;  %p34_p6 = scmp.eq.s32.totalorder %s31_s19, 0 }
   0xa   : > { %p362_p8 = scmp.lt.s32.totalorder %s501_s14, 4  ;;  %s131_s22 = sand.u32 1, %s489_s11  }
   0xb   : > { %p563_p7 = por %p50_p5, %p49_p4  ;;  %s351_s23 = sshll.u32 %s497_s13, 3 }
   0xc   : > { %s569_s21 = scalar_select %p34_p6, %s489_s11, %s36_s17  }
   0xd   : > { %s350_s24 = sshll.u32 %s131_s22, 3  ;;  %s140_s27 = scalar_lea.hbm %s624_s0, %s351_s23 }
   0xe   : > { %s142_s28 = sshll.u32 %s140_s27, 4  ;;  %s135_s29 = scalar_lea.vmem [#allocation2], %s350_s24  ;;  %s143_s28 = int_to_ptr.hbm [resolvable:$true] %s142_s28 }
   0xf   : > { %s144_s30 = sshll.u32 %s135_s29, 4  ;;  %p359_p9 = pnand %p362_p8, %p556_p3  ;;  %s145_s30 = int_to_ptr.vmem [resolvable:$true] %s144_s30 }
  0x10   : > { %p352_p10 = scmp.ge.s32.totalorder %s501_s14, 1  ;;  %p149_p11 = scmp.lt.s32.totalorder %s501_s14, 5 }
  0x11   : > { %s132_s3 = scalar_lea.sflag [#allocation3], %s131_s22 }
  0x12   : > { %361 = dma.hbm_to_vmem [thread:$0]  (!%p359_p9), %s143_s28, 128, %s145_s30, %s132_s3  }
  0x13   : > { %p150_p12 = pnand %p352_p10, %p149_p11 }
  0x14   : > { %s155_s4 = sand.u32 (!%p150_p12), 1, %s485_s10  }
  0x15   : > { %153 = sbr.rel (%p150_p12) target bundleno = 401 (0x191), region = 28  ;;  %s353_s5 = sshll.u32 (!%p150_p12), %s155_s4, 3 }
  0x16   : > { %s156_s6 = scalar_lea.sflag (!%p150_p12), [#allocation3], %s155_s4  ;;  %s159_s7 = scalar_lea.vmem (!%p150_p12), [#allocation2], %s353_s5 }
  0x1a   : > { %476 = dma.done.wait (%p563_p7), %s156_s6, 128  }
  0x1b   : > { %478 = vsyncadd (%p563_p7), %s156_s6, 4294967168  ;;  %v196_v0 = vlaneseq  ;;  %vm206_vm0 = vcmask 261120   ;;  %v194_v2 = vld [vmem:[%s159_s7] sm:$0xff]  ;;  %v416_v4 = vld [vmem:[%s625_s1] ss:$0 sm:$0xff]  ;;  %v503_v14 = vmov 0  }
  0x1c   : > { %v207_v3 = vsel %vm206_vm0, %v194_v2, -inf  ;;  %414 = vset.pattern.permute.xlu2 %v503_v14  ;;  %p185_p13 = scmp.lt.s32.totalorder %s493_s12, 3  ;;  %vm192_vm2 = vcmask 57344   ;;  %v504_v16 = vmov 0.0   ;;  %v195_v31 = vld [vmem:[%s625_s1] sm:$0x1] }
  0x1d   : > { %v200_v1 = vshrl.u32 %v196_v0, 7  ;;  %208 = vmax.xlane.f32.xlu0 %v207_v3  ;;  %v197_v10 = vand.u32 127, %v196_v0  ;;  %vm227_vm3 = vcmp.ne.s32.totalorder %v195_v31, 4294967196 }
  0x1e   : > { %s637_s12 = smov (!%p185_p13, %s493_s12), 3 }
  0x1f   : > { %413 = vset.pattern.permute.xlu0 %v200_v1  ;;  %s596_s18 = scalar_lea.vmem %s626_s2, %s637_s12  ;;  %vm228_vm4 = vcmp.lt.s32.totalorder %v197_v10, 8 }
  0x20   : > { %193 = vst.msk [vmem:[%s596_s18] sm:$0x1] %vm192_vm2, %v504_v16  ;;  %vm229_vm5 = vmand %vm227_vm3, %vm228_vm4 }
  0x27   : > { %v261_v34 = vld [vmem:[%s596_s18] sm:$0x1] }
  0x31   : > { %203 = vperm.xlu0 %413, %v416_v4  }
  0x39   : > { %415 = vset.pattern.permute.xlu0 %v503_v14 }
  0x90   : > { %v209_v5 = vpop.xlane.xlu0 %208 }
  0x91   : > { %v210_v6 = vsub.f32 %v194_v2, %v209_v5 }
  0x93   : > { %v211_v7 = vmul.f32 1.442695, %v210_v6 }
  0x95   : > { %417 = vpow2.f32 %v211_v7 }
  0x9b   : > { %v418_v8 = vpop.eup %417 }
  0x9c   : > { %v213_v9 = vsel %vm206_vm0, %v418_v8, 0.0 }
  0x9d   : > { %214 = vadd.xlane.f32.xlu1 %v213_v9 }
  0xa3   : > { %v204_v11 = vpop.permute.xlu0 %203 }
  0xa4   : > { %vm205_vm1 = vcmp.eq.s32.totalorder %v197_v10, %v204_v11 }
  0xa5   : > { %v216_v12 = vsel %vm205_vm1, %v194_v2, 0.0 }
  0xa6   : > { %v217_v13 = vsel %vm206_vm0, %v216_v12, 0.0 }
  0xa7   : > { %218 = vadd.xlane.f32.xlu1 %v217_v13 }
 0x110   : > { %v215_v15 = vpop.xlane.xlu1 %214 }
 0x111   : > { %419 = vlog2.f32 %v215_v15 }
 0x117   : > { %v420_v17 = vpop.eup %419 }
 0x118   : > { %v221_v19 = vmul.f32 0.6931472, %v420_v17 }
 0x11a   : > { %v219_v18 = vpop.xlane.xlu1 %218 }
 0x11b   : > { %v222_v20 = vsub.f32 %v219_v18, %v209_v5 }
 0x11d   : > { %v223_v21 = vsub.f32 %v221_v19, %v222_v20 }
 0x11f   : > { %v231_v22 = vperm.slane %v223_v21, 0  ;;  %v232_v23 = vperm.slane %v223_v21, 1  ;;  %v233_v24 = vperm.slane %v223_v21, 2  ;;  %v234_v25 = vperm.slane %v223_v21, 3 }
 0x120   : > { %v235_v26 = vperm.slane %v223_v21, 4  ;;  %v236_v27 = vperm.slane %v223_v21, 5  ;;  %v237_v28 = vperm.slane %v223_v21, 6  ;;  %v238_v29 = vperm.slane %v223_v21, 7 }
 0x121   : > { %239 = vst [vmem:[#allocation1] ss:$9 sm:$0xff] %v231_v22 }
 0x122   : > { %241 = vst [vmem:[#allocation1 + $0x1] ss:$9 sm:$0xff] %v232_v23 }
 0x123   : > { %243 = vst [vmem:[#allocation1 + $0x2] ss:$9 sm:$0xff] %v233_v24 }
 0x124   : > { %245 = vst [vmem:[#allocation1 + $0x3] ss:$9 sm:$0xff] %v234_v25 }
 0x125   : > { %247 = vst [vmem:[#allocation1 + $0x4] ss:$9 sm:$0xff] %v235_v26 }
 0x126   : > { %249 = vst [vmem:[#allocation1 + $0x5] ss:$9 sm:$0xff] %v236_v27 }
 0x127   : > { %251 = vst [vmem:[#allocation1 + $0x6] ss:$9 sm:$0xff] %v237_v28 }
 0x128   : > { %253 = vst [vmem:[#allocation1 + $0x7] ss:$9 sm:$0xff] %v238_v29 }
 0x12f   : > { %v254_v30 = vld [vmem:[#allocation1] sm:$0xff] }
 0x130   : > { %256 = vperm.xlu2 %414, %v254_v30  }
 0x18a   : > { %v257_v32 = vpop.permute.xlu2 %256 }
 0x18b   : > { %v258_v33 = vperm.slane %v257_v32, %v197_v10 }
 0x18d   : > { %v260_v35 = vsel %vm229_vm5, %v258_v33, 0.0 }
 0x18e   : > { %v262_v36 = vadd.f32 %v261_v34, %v260_v35 }
 0x190   : > { %264 = vst.msk [vmem:[%s596_s18] sm:$0x1] %vm192_vm2, %v262_v36 }
 0x191 PF: > { %s15_s14 = sadd.s32 1, %s501_s14   ;;  %s629_s9 = smov %s485_s10 }
 0x192   : > { %p12_p0 = scmp.ge.s32.totalorder %s15_s14, 6   ;;  %s630_s10 = smov %s489_s11 }
 0x193   : > { %s631_s11 = smov %s569_s21  ;;  %s632_s12 = smov %s497_s13 }
 0x194   : > { %s633_s13 = smov %s635_s16  ;;  %14 = sbr.rel (!%p12_p0) target bundleno = 4 (0x4), region = 82 }
 0x199   :  { %282 = vsyncpa [#allocation3], 1 }
 0x19a   :  { %284 = vsyncpa [#allocation3 + $0x1], 1 }

</bundles_post_ra>
